<compile_context>
chip_gen: v7x
topology: tpu7x:2x2x1
jax: 0.10.0
libtpu: 0.0.40
codegen_flags: <defaults>
</compile_context>

<pallas_src>
import jax
import jax.numpy as jnp
from jax.experimental import pallas as pl
from jax.experimental.pallas import tpu as pltpu

HIDDEN = 50      # hidden width of linear2 output / linear input
LANES = 128      # TPU vreg lane width
SMALL_M = 1 << 16  # below this many elements, single-block path (grid overhead dominates)


def affine_kernel(coef_ref, x_ref, o_ref):
    # coef_ref: SMEM (2,) f32 -> [a, c]; elementwise y = a*x + c (single VPU FMA).
    o_ref[...] = x_ref[...] * coef_ref[0] + coef_ref[1]


def _round_up(n, m):
    return ((n + m - 1) // m) * m


def linear_model_forward(x, w2, b2, w1, b1, *, tile_rows=4096):
    """x: (B, T, 1) float32. Returns (B, T, 1), matching LinearModel.forward()."""
    B, T, F = x.shape
    assert F == 1
    M = B * T

    # Collapse both Linear layers into two scalars (computed once, outside the grid).
    a = jnp.dot(w1[0], w2[:, 0])                      # scalar: w1 . w2
    c = jnp.dot(w1[0], b2) + b1[0]                    # scalar: w1 . b2 + b1
    coef = jnp.stack([a, c]).astype(jnp.float32)      # (2,) -> SMEM

    x_flat = x.reshape(M).astype(jnp.float32)

    # ---------- Small-input path: one full-array block, no padding / slicing. ----------
    if M < SMALL_M:
        x2d = x_flat.reshape(1, M)
        out2d = pl.pallas_call(
            affine_kernel,
            out_shape=jax.ShapeDtypeStruct((1, M), jnp.float32),
            grid=(1,),
            in_specs=[
                pl.BlockSpec(memory_space=pltpu.SMEM),      # [a, c] scalars
                pl.BlockSpec((1, M), lambda i: (0, 0)),     # whole array, one block
            ],
            out_specs=pl.BlockSpec((1, M), lambda i: (0, 0)),
        )(coef, x2d)
        return out2d.reshape(B, T, 1)

    # ---------- Large-input path: lane-dense (rows, 128) tiles, pipelined grid. ----------
    if M % LANES == 0:
        rows = M // LANES
        x2d = x_flat.reshape(rows, LANES)               # free metadata reshape, no HBM copy
    else:
        rows = _round_up(pl.cdiv(M, LANES), 8)          # pad only to next 8x128 slab
        x2d = jnp.pad(x_flat, (0, rows * LANES - M)).reshape(rows, LANES)

    # Tile rows: >= ~1-2 MiB blocks to amortize ~0.35 us/step overhead, but capped so
    # the grid keeps >= ~4 steps (megacore sharding on v7x) and 4 x tile bytes stays
    # well under the 32 MiB scoped VMEM limit (v7x has 64 MiB physical).
    t = min(tile_rows, max(8, _round_up(pl.cdiv(rows, 4), 8)))
    grid = (pl.cdiv(rows, t),)                          # partial last block masked by Pallas

    out2d = pl.pallas_call(
        affine_kernel,
        out_shape=jax.ShapeDtypeStruct((rows, LANES), jnp.float32),
        grid=grid,
        in_specs=[
            pl.BlockSpec(memory_space=pltpu.SMEM),          # [a, c] scalars
            pl.BlockSpec((t, LANES), lambda i: (i, 0)),     # x tile (lane-dense)
        ],
        out_specs=pl.BlockSpec((t, LANES), lambda i: (i, 0)),
        compiler_params=pltpu.CompilerParams(
            dimension_semantics=("parallel",),              # shard rows across TCs on v7x
            vmem_limit_bytes=32 * 1024 * 1024,              # safe on v5e/v6e/v7x
        ),
    )(coef, x2d)

    if M % LANES == 0:
        return out2d.reshape(B, T, 1)                       # free metadata reshape
    return out2d.reshape(-1)[:M].reshape(B, T, 1)           # only ragged M pays a slice


if __name__ == "__main__":
    key = jax.random.PRNGKey(0)
    kx, k1, k2, k3, k4, kx2 = jax.random.split(key, 6)

    # Deterministic parameter init, PyTorch Linear convention:
    # W ~ U(-1/sqrt(fan_in), 1/sqrt(fan_in))
    # linear2: Linear(1 -> 50): weight (50, 1), bias (50,)
    bound2 = 1.0 / jnp.sqrt(1.0)
    w2 = jax.random.uniform(k1, (HIDDEN, 1), jnp.float32, -bound2, bound2)
    b2 = jax.random.uniform(k2, (HIDDEN,), jnp.float32, -bound2, bound2)
    # linear: Linear(50 -> 1): weight (1, 50), bias (1,)
    bound1 = 1.0 / jnp.sqrt(float(HIDDEN))
    w1 = jax.random.uniform(k3, (1, HIDDEN), jnp.float32, -bound1, bound1)
    b1 = jax.random.uniform(k4, (1,), jnp.float32, -bound1, bound1)

    def ref_forward(xin):
        Bc, Tc, _ = xin.shape
        return ((xin.reshape(-1, 1) @ w2.T + b2) @ w1.T + b1).reshape(Bc, Tc, 1)

    # Small path (single full-array block): the module's tiny test shape.
    B, T = 2, 8
    x_small = jax.random.normal(kx, (B, T, 1), dtype=jnp.float32)
    out_small = jax.block_until_ready(linear_model_forward(x_small, w2, b2, w1, b1))
    assert out_small.shape == (B, T, 1)
    assert jnp.allclose(out_small, ref_forward(x_small), atol=1e-5, rtol=1e-5)

    # Tiled path (lane-dense grid; M % 128 == 0 so no pad/unpad copies).
    B2, T2 = 4, 32768
    x_big = jax.random.normal(kx2, (B2, T2, 1), dtype=jnp.float32)
    out_big = jax.block_until_ready(linear_model_forward(x_big, w2, b2, w1, b1))
    assert out_big.shape == (B2, T2, 1)
    assert jnp.allclose(out_big, ref_forward(x_big), atol=1e-5, rtol=1e-5)

    print("KERNEL_OK")
</pallas_src>

<mosaic_0001>
module attributes {stable_mosaic.version = 11 : i64} {
  func.func @affine_kernel(%arg0: i32, %arg1: memref<2xf32, #tpu.memory_space<smem>>, %arg2: memref<1x16xf32, #tpu.memory_space<vmem>>, %arg3: memref<1x16xf32, #tpu.memory_space<vmem>>) attributes {dimension_semantics = [#tpu.dimension_semantics<arbitrary>], iteration_bounds = array<i64: 1>, scalar_prefetch = 0 : i64, scratch_operands = 0 : i64, tpu.core_type = #tpu.core_type<tc>, window_params = [{transform_indices = @transform_0, window_bounds = array<i64: 2>}, {pipeline_mode = #tpu.pipeline_mode<synchronous>, transform_indices = @transform_1, window_bounds = array<i64: 1, 16>}, {pipeline_mode = #tpu.pipeline_mode<synchronous>, transform_indices = @transform_2, window_bounds = array<i64: 1, 16>}]} {
    %c0 = arith.constant 0 : index
    %c0_0 = arith.constant 0 : index
    %0 = vector.load %arg2[%c0, %c0_0] : memref<1x16xf32, #tpu.memory_space<vmem>>, vector<1x16xf32>
    %c0_1 = arith.constant 0 : index
    %1 = memref.load %arg1[%c0_1] : memref<2xf32, #tpu.memory_space<smem>>
    %2 = vector.broadcast %1 : f32 to vector<1x16xf32>
    %3 = arith.mulf %0, %2 : vector<1x16xf32>
    %c1 = arith.constant 1 : index
    %4 = memref.load %arg1[%c1] : memref<2xf32, #tpu.memory_space<smem>>
    %5 = vector.broadcast %4 : f32 to vector<1x16xf32>
    %6 = arith.addf %3, %5 : vector<1x16xf32>
    %c0_2 = arith.constant 0 : index
    %c0_3 = arith.constant 0 : index
    %7 = vector.load %arg3[%c0_2, %c0_3] : memref<1x16xf32, #tpu.memory_space<vmem>>, vector<1x16xf32>
    tpu.vector_store %arg3[%c0_2, %c0_3], %6 {strides = array<i32>} : memref<1x16xf32, #tpu.memory_space<vmem>>, vector<1x16xf32>,
    return
  }
  func.func @transform_0(%arg0: i32) -> i32 {
    %c0_i32 = arith.constant 0 : i32
    %c0_i32_0 = arith.constant 0 : i32
    return %c0_i32 : i32
  }
  func.func @transform_1(%arg0: i32) -> (i32, i32) {
    %c0_i32 = arith.constant 0 : i32
    %c0_i32_0 = arith.constant 0 : i32
    %c0_i32_1 = arith.constant 0 : i32
    return %c0_i32, %c0_i32_0 : i32, i32
  }
  func.func @transform_2(%arg0: i32) -> (i32, i32) {
    %c0_i32 = arith.constant 0 : i32
    %c0_i32_0 = arith.constant 0 : i32
    %c0_i32_1 = arith.constant 0 : i32
    return %c0_i32, %c0_i32_0 : i32, i32
  }
}

</mosaic_0001>

<bundles_post_ra>
// kernel: tpu_custom_call.1
= control target key start
LH: loop header
LB: loop body
LE: loop exit
PB: predicated region body
PF: predicated region fallthrough
CT: control target
= control target key end

     0   :  { %7 = vsyncpa [#allocation4], 0  ;;  %s130_s0 = inlined_call_operand.hbm [shape: f32[2], index: 0, kind: input, shape index: {}]   ;;  %s131_s1 = inlined_call_operand.vmem [shape: f32[1,16], index: 1, kind: input, shape index: {}]   ;;  %s132_s2 = inlined_call_operand.hbm [shape: f32[1,16], index: 2, kind: output, shape index: {}]  }
   0x1   :  { %8 = vsyncpa [#allocation3], 0  ;;  %s50_s11 = scalar_lea.hbm %s130_s0, 16 }
   0x2   :  { %p51_p0 = scmp.ne.s32.totalorder %s130_s0, %s50_s11  ;;  %p54_p1 = scmp.lt.u32.totalorder %s50_s11, %s130_s0 }
   0x4   :  { %p56_p2 = pnand %p54_p1, %p51_p0 }
   0x6   :  { %59 = shalt.err (!%p56_p2)
}
   0x7   :  { %s86_s16 = smov [#allocation2]  }
   0x8   :  { %16 = dma.hbm_to_smem %s130_s0, 16, %s86_s16, [#allocation4]  }
   0x9   :  { %82 = dma.done.wait [#allocation4], 16  }
   0xa   :  { %83 = vsyncadd [#allocation4], 4294967280 }
   0xb   :  { %22 = sfence }
   0xc   :  { %s24_s19 = sld [smem:[#allocation2]]  ;;  %s47_s20 = sld [smem:[#allocation2 + $0x1]]  ;;  %v23_v0 = vld [vmem:[%s131_s1] sm:$0x1]  ;;  %vm30_vm0 = vcmask 122880  }
   0xd   :  { %s87_s23 = smov [#allocation5]  }
   0xe   :  { %s38_s24 = sshll.u32 %s87_s23, 4  ;;  %s39_s24 = int_to_ptr.vmem [resolvable:$true] %s38_s24 }
   0xf   :  { %s60_s25 = scalar_lea.vmem %s39_s24, 16  ;;  %s64_s0 = scalar_lea.vmem %s39_s24, 32 }
  0x10   :  { %p61_p3 = scmp.ne.s32.totalorder %s39_s24, %s60_s25  ;;  %p65_p4 = scmp.lt.s32.totalorder %s39_s24, %s39_s24 }
  0x11   :  { %p66_p5 = scmp.lt.s32.totalorder %s64_s0, %s60_s25 }
  0x12   :  { %v25_v1 = vstv %s24_s19  ;;  %v28_v2 = vstv %s47_s20 }
  0x13   :  { %v26_v3 = vmul.f32 %v25_v1, %v23_v0  ;;  %p67_p6 = por %p66_p5, %p65_p4 }
  0x15   :  { %v29_v4 = vadd.f32 %v28_v2, %v26_v3  ;;  %p68_p7 = pnand %p67_p6, %p61_p3 }
  0x17   :  { %31 = vst.msk [vmem:[#allocation5] sm:$0x1] %vm30_vm0, %v29_v4 }
  0x18   :  { %71 = shalt.err (!%p68_p7)
}
  0x19   :  { %s72_s1 = scalar_lea.hbm %s132_s2, 16 }
  0x1a   :  { %p73_p8 = scmp.ne.s32.totalorder %s132_s2, %s72_s1  ;;  %p76_p9 = scmp.lt.u32.totalorder %s72_s1, %s132_s2 }
  0x1c   :  { %p78_p10 = pnand %p76_p9, %p73_p8 }
  0x1e   :  { %81 = shalt.err (!%p78_p10)
}
  0x1f   :  { %41 = dma.vmem_to_hbm [thread:$0]  %s39_s24, 16, %s132_s2, [#allocation3]  }
  0x20   :  { %84 = dma.done.wait [#allocation3], 16  }
  0x21   :  { %85 = vsyncadd [#allocation3], 4294967280 }
  0x22   :  { %45 = vsyncpa [#allocation3], 1 }
  0x23   :  { %46 = vsyncpa [#allocation4], 1 }

</bundles_post_ra>
